<compile_context>
chip_gen: v7x
topology: tpu7x:2x2x1
jax: 0.10.0
libtpu: 0.0.40
codegen_flags: <defaults>
</compile_context>

<pallas_src>
from functools import partial

import jax
import jax.numpy as jnp
from jax import lax
from jax.experimental import pallas as pl

# Small, self-consistent shapes.
B, S_ENC, S_DEC, D, VOCAB = 2, 8, 8, 32, 16
N_ENC = B * S_ENC            # 16 rows (batch folded into sublanes)
N_DEC = B * S_DEC            # 16 rows
N_TOT = N_ENC + N_DEC        # 32 rows

# Row offsets inside the packed weight slab (all 8-row aligned).
R_EMB = 0                    # rows [0, 32)   : stacked [emb_enc; emb_dec]
R_WENC = 2 * VOCAB           # rows [32, 64)  : w_enc
R_WV = R_WENC + D            # rows [64, 96)  : wv
R_WO = R_WV + D              # rows [96, 128) : wo
R_BENC = R_WO + D            # row  128       : b_enc (padded to 8 rows)
R_BO = R_BENC + 8            # row  136       : bo    (padded to 8 rows)
N_WROWS = R_BO + 8           # 144


# --------------------------------------------------------------------------
# Single fused kernel (no grid: whole problem lives in VMEM for one invocation)
# --------------------------------------------------------------------------
def _fused_encdec_kernel(ids_ref, masks_ref, w_ref, out_ref):
    f32 = jnp.float32

    # ---- carve the packed weight slab with static (aligned) ref slices -----
    emb_tbl = w_ref[R_EMB:R_EMB + 2 * VOCAB, :]     # (32, D) [emb_enc; emb_dec]
    w_enc = w_ref[R_WENC:R_WENC + D, :]             # (D, D)
    wv = w_ref[R_WV:R_WV + D, :]                    # (D, D)
    wo = w_ref[R_WO:R_WO + D, :]                    # (D, D)
    b_enc = w_ref[R_BENC:R_BENC + 1, :]             # (1, D)
    bo = w_ref[R_BO:R_BO + 1, :]                    # (1, D)

    # ---- fused embedding lookup: ONE block-diagonal one-hot MXU dot --------
    # ids rows 0:16 are encoder ids (vocab [0,16)), rows 16:32 are decoder ids
    # pre-offset by VOCAB, so a single one-hot against the stacked table gathers
    # both streams in one MXU pass.  HIGHEST precision -> bit-exact vs jnp.take.
    oh = (ids_ref[...] ==
          lax.broadcasted_iota(jnp.int32, (N_TOT, 2 * VOCAB), 1)).astype(f32)
    x_all = jnp.dot(oh, emb_tbl, preferred_element_type=f32,
                    precision=lax.Precision.HIGHEST)                 # (32, D)
    x_enc = x_all[0:N_ENC, :]                                        # (16, D)
    x_dec = x_all[N_ENC:N_TOT, :]                                    # (16, D)

    # ---- encoder: relu(x @ W + b), whole batch as one (B*S, D) slab --------
    h = jnp.maximum(
        jnp.dot(x_enc, w_enc, preferred_element_type=f32) + b_enc, 0.0)   # (16, D)

    # ---- pooling (+ expansion) as ONE matmul -------------------------------
    # masks_ref rows 0:16 hold the pre-built block-diagonal pooling matrix
    # P[(b,t), (b,s)] = menc[b,s] / S_ENC  (torch.mean semantics: /S incl. masked),
    # already shaped (N_DEC, N_ENC), so the result is the pooled encoder memory
    # expanded to every decoder row — no separate "expand" dot / select needed.
    pooled_exp = jnp.dot(masks_ref[0:N_DEC, :], h,
                         preferred_element_type=f32)                 # (16, D)

    # ---- decoder: cross-attention over the pooled memory -------------------
    # pooling=True makes every memory row of a batch identical, so the masked
    # softmax attention reduces EXACTLY to ctx = pooled @ Wv (Q/K and softmax
    # cancel algebraically).  Valid ONLY for the pooling=True path.
    ctx = jnp.dot(pooled_exp, wv, preferred_element_type=f32)        # (16, D)

    out = jnp.maximum(
        jnp.dot(x_dec + ctx, wo, preferred_element_type=f32) + bo, 0.0)
    mdec = masks_ref[N_DEC:2 * N_DEC, :][:, 0:1]                     # (16, 1)
    out_ref[...] = out * mdec            # zero padded decoder positions


# --------------------------------------------------------------------------
# Parameter packing: built ONCE at init (single HBM->VMEM DMA at call time)
# --------------------------------------------------------------------------
def pack_params(params):
    f32 = jnp.float32

    def pad8(x):  # biases padded to an 8-row (sublane-aligned) block
        return jnp.pad(x.astype(f32), ((0, 8 - x.shape[0]), (0, 0)))

    slab = jnp.concatenate([
        params["emb_enc"].astype(f32), params["emb_dec"].astype(f32),
        params["w_enc"].astype(f32), params["wv"].astype(f32),
        params["wo"].astype(f32),
        pad8(params["b_enc"]), pad8(params["bo"]),
    ], axis=0)
    assert slab.shape == (N_WROWS, D)
    return slab


# --------------------------------------------------------------------------
# Full SimpleEncoderDecoder.forward (pooling=True, decoder present)
# --------------------------------------------------------------------------
@partial(jax.jit, static_argnames=("pooling",))
def simple_encoder_decoder_forward(wslab, ids_encoder, masks_encoder,
                                   ids_decoder, masks_decoder, pooling=True):
    # TODO(synk): pooling=False branch (full per-position cross-attention memory,
    # where the softmax does NOT cancel) and the Python-side
    # self.cache.output_encoder_pooled bookkeeping are not modeled here.
    assert pooling, "fused kernel implements the pooling=True path only"

    f32 = jnp.float32

    # Merge both id streams into one (32,1) array; decoder ids pre-offset into
    # the stacked embedding table.
    ids_all = jnp.concatenate([
        jnp.asarray(ids_encoder, jnp.int32).reshape(N_ENC),
        jnp.asarray(ids_decoder, jnp.int32).reshape(N_DEC) + VOCAB,
    ]).reshape(N_TOT, 1)

    # Pre-build the block-diagonal pooling matrix (already divided by S_ENC) and
    # stack the decoder mask under it -> one (32,16) mask slab, one DMA.
    menc = masks_encoder.astype(f32).reshape(B, S_ENC)               # (B, S_ENC)
    row_b = jnp.arange(N_DEC) // S_DEC
    col_b = jnp.arange(N_ENC) // S_ENC
    col_s = jnp.arange(N_ENC) % S_ENC
    pool_mat = jnp.where(row_b[:, None] == col_b[None, :],
                         menc[row_b][:, col_s], 0.0) * (1.0 / S_ENC)  # (N_DEC, N_ENC)
    mdec = jnp.broadcast_to(masks_decoder.astype(f32).reshape(N_DEC, 1),
                            (N_DEC, N_ENC))
    mask_slab = jnp.concatenate([pool_mat, mdec], axis=0)             # (32, 16)

    out_flat = pl.pallas_call(
        _fused_encdec_kernel,
        out_shape=jax.ShapeDtypeStruct((N_DEC, D), f32),
        # No grid / BlockSpecs: single invocation, every operand is a full-array
        # VMEM block; total footprint (with (8,128) tile padding) < 100 KiB.
    )(ids_all, mask_slab, wslab)

    return out_flat.reshape(B, S_DEC, D)


# --------------------------------------------------------------------------
# Pure-JAX reference (full, un-shortcut computation) for correctness check.
# Reference matmuls are pinned to HIGHEST precision explicitly (no global flag).
# --------------------------------------------------------------------------
def reference_forward(params, ids_encoder, masks_encoder, ids_decoder, masks_decoder):
    hp = lax.Precision.HIGHEST
    emb_enc = jnp.take(params["emb_enc"], ids_encoder, axis=0)
    out_enc = jnp.maximum(
        jnp.matmul(emb_enc, params["w_enc"], precision=hp) + params["b_enc"], 0.0)
    menc_f = masks_encoder.astype(jnp.float32)                        # (B,1,S)
    masked = out_enc * jnp.swapaxes(menc_f, -1, -2)
    pooled = jnp.mean(masked, axis=-2, keepdims=True)                 # (B,1,D)
    output = jnp.broadcast_to(pooled, out_enc.shape)

    emb_dec = jnp.take(params["emb_dec"], ids_decoder, axis=0)
    q = jnp.matmul(emb_dec, params["wq"], precision=hp)
    k = jnp.matmul(output, params["wk"], precision=hp)
    v = jnp.matmul(output, params["wv"], precision=hp)
    scores = jnp.einsum("btd,bsd->bts", q, k, precision=hp) / jnp.sqrt(jnp.float32(D))
    scores = jnp.where(menc_f > 0.5, scores, -1e9)
    attn = jax.nn.softmax(scores, axis=-1)
    ctx = jnp.einsum("bts,bsd->btd", attn, v, precision=hp)
    out = jnp.maximum(
        jnp.matmul(emb_dec + ctx, params["wo"], precision=hp) + params["bo"], 0.0)
    return out * jnp.swapaxes(masks_decoder.astype(jnp.float32), -1, -2)


if __name__ == "__main__":
    key = jax.random.PRNGKey(0)
    ks = jax.random.split(key, 12)
    params = {
        "emb_enc": 0.1 * jax.random.normal(ks[0], (VOCAB, D), jnp.float32),
        "emb_dec": 0.1 * jax.random.normal(ks[1], (VOCAB, D), jnp.float32),
        "w_enc": 0.1 * jax.random.normal(ks[2], (D, D), jnp.float32),
        "b_enc": 0.1 * jax.random.normal(ks[3], (1, D), jnp.float32),
        "wq": 0.1 * jax.random.normal(ks[4], (D, D), jnp.float32),   # reference only
        "wk": 0.1 * jax.random.normal(ks[5], (D, D), jnp.float32),   # reference only
        "wv": 0.1 * jax.random.normal(ks[6], (D, D), jnp.float32),
        "wo": 0.1 * jax.random.normal(ks[7], (D, D), jnp.float32),
        "bo": 0.1 * jax.random.normal(ks[8], (1, D), jnp.float32),
    }
    wslab = pack_params(params)   # packed ONCE at init; single input slab

    ids_encoder = jax.random.randint(ks[9], (B, S_ENC), 0, VOCAB)
    ids_decoder = jax.random.randint(ks[10], (B, S_DEC), 0, VOCAB)
    enc_lens = jnp.array([S_ENC, 5])
    dec_lens = jnp.array([S_DEC, 6])
    masks_encoder = (jnp.arange(S_ENC)[None, :] < enc_lens[:, None])[:, None, :]  # (B,1,S) bool
    masks_decoder = (jnp.arange(S_DEC)[None, :] < dec_lens[:, None])[:, None, :]  # (B,1,T) bool

    out = simple_encoder_decoder_forward(wslab, ids_encoder, masks_encoder,
                                         ids_decoder, masks_decoder, pooling=True)
    out = jax.block_until_ready(out)

    ref = reference_forward(params, ids_encoder, masks_encoder, ids_decoder, masks_decoder)
    assert out.shape == (B, S_DEC, D)
    # Embedding dot is exact (HIGHEST); the remaining kernel dots run at default
    # MXU precision, so allow bf16-pass-level accumulation error vs the HIGHEST
    # precision reference.
    assert jnp.allclose(out, ref, atol=2e-3, rtol=2e-3), "mismatch vs pure-JAX reference"
    print("KERNEL_OK")
</pallas_src>

<mosaic_0001>
module attributes {stable_mosaic.version = 11 : i64} {
  func.func @_fused_encdec_kernel(%arg0: memref<32x1xi32, #tpu.memory_space<vmem>>, %arg1: memref<32x16xf32, #tpu.memory_space<vmem>>, %arg2: memref<144x32xf32, #tpu.memory_space<vmem>>, %arg3: memref<16x32xf32, #tpu.memory_space<vmem>>) attributes {dimension_semantics = [], scalar_prefetch = 0 : i64, scratch_operands = 0 : i64, tpu.core_type = #tpu.core_type<tc>} {
    %c0 = arith.constant 0 : index
    %c0_0 = arith.constant 0 : index
    %0 = vector.load %arg2[%c0, %c0_0] : memref<144x32xf32, #tpu.memory_space<vmem>>, vector<32x32xf32>
    %c32 = arith.constant 32 : index
    %c0_1 = arith.constant 0 : index
    %1 = vector.load %arg2[%c32, %c0_1] : memref<144x32xf32, #tpu.memory_space<vmem>>, vector<32x32xf32>
    %c64 = arith.constant 64 : index
    %c0_2 = arith.constant 0 : index
    %2 = vector.load %arg2[%c64, %c0_2] : memref<144x32xf32, #tpu.memory_space<vmem>>, vector<32x32xf32>
    %c96 = arith.constant 96 : index
    %c0_3 = arith.constant 0 : index
    %3 = vector.load %arg2[%c96, %c0_3] : memref<144x32xf32, #tpu.memory_space<vmem>>, vector<32x32xf32>
    %c128 = arith.constant 128 : index
    %c0_4 = arith.constant 0 : index
    %4 = vector.load %arg2[%c128, %c0_4] : memref<144x32xf32, #tpu.memory_space<vmem>>, vector<1x32xf32>
    %c136 = arith.constant 136 : index
    %c0_5 = arith.constant 0 : index
    %5 = vector.load %arg2[%c136, %c0_5] : memref<144x32xf32, #tpu.memory_space<vmem>>, vector<1x32xf32>
    %c0_6 = arith.constant 0 : index
    %c0_7 = arith.constant 0 : index
    %6 = vector.load %arg0[%c0_6, %c0_7] : memref<32x1xi32, #tpu.memory_space<vmem>>, vector<32x1xi32>
    %7 = tpu.iota {dimensions = array<i32: 1>} : vector<32x32xi32>
    %8 = vector.broadcast %6 : vector<32x1xi32> to vector<32x32xi32>
    %9 = arith.cmpi eq, %8, %7 : vector<32x32xi32>
    %10 = arith.extui %9 : vector<32x32xi1> to vector<32x32xi32>
    %11 = arith.sitofp %10 : vector<32x32xi32> to vector<32x32xf32>
    %cst = arith.constant dense<0.000000e+00> : vector<32x32xf32>
    %12 = tpu.matmul %11, %0, %cst {dimension_numbers = #tpu.dot_dimension_numbers<[1], [0], [0], [1], [0, 0, 1, 1], [], []>, precision = #tpu.contract_precision<fp32>} : vector<32x32xf32>, vector<32x32xf32>, vector<32x32xf32> -> vector<32x32xf32>
    %13 = vector.extract_strided_slice %12 {offsets = [0, 0], sizes = [16, 32], strides = [1, 1]} : vector<32x32xf32> to vector<16x32xf32>
    %14 = vector.extract_strided_slice %12 {offsets = [16, 0], sizes = [16, 32], strides = [1, 1]} : vector<32x32xf32> to vector<16x32xf32>
    %cst_8 = arith.constant dense<0.000000e+00> : vector<16x32xf32>
    %15 = tpu.matmul %13, %1, %cst_8 {dimension_numbers = #tpu.dot_dimension_numbers<[1], [0], [0], [1], [0, 0, 1, 1], [], []>} : vector<16x32xf32>, vector<32x32xf32>, vector<16x32xf32> -> vector<16x32xf32>
    %16 = vector.broadcast %4 : vector<1x32xf32> to vector<16x32xf32>
    %17 = arith.addf %15, %16 : vector<16x32xf32>
    %cst_9 = arith.constant 0.000000e+00 : f32
    %18 = vector.broadcast %cst_9 : f32 to vector<16x32xf32>
    %19 = arith.maximumf %17, %18 : vector<16x32xf32>
    %c0_10 = arith.constant 0 : index
    %c0_11 = arith.constant 0 : index
    %20 = vector.load %arg1[%c0_10, %c0_11] : memref<32x16xf32, #tpu.memory_space<vmem>>, vector<16x16xf32>
    %cst_12 = arith.constant dense<0.000000e+00> : vector<16x32xf32>
    %21 = tpu.matmul %20, %19, %cst_12 {dimension_numbers = #tpu.dot_dimension_numbers<[1], [0], [0], [1], [0, 0, 1, 1], [], []>} : vector<16x16xf32>, vector<16x32xf32>, vector<16x32xf32> -> vector<16x32xf32>
    %cst_13 = arith.constant dense<0.000000e+00> : vector<16x32xf32>
    %22 = tpu.matmul %21, %2, %cst_13 {dimension_numbers = #tpu.dot_dimension_numbers<[1], [0], [0], [1], [0, 0, 1, 1], [], []>} : vector<16x32xf32>, vector<32x32xf32>, vector<16x32xf32> -> vector<16x32xf32>
    %23 = arith.addf %14, %22 : vector<16x32xf32>
    %cst_14 = arith.constant dense<0.000000e+00> : vector<16x32xf32>
    %24 = tpu.matmul %23, %3, %cst_14 {dimension_numbers = #tpu.dot_dimension_numbers<[1], [0], [0], [1], [0, 0, 1, 1], [], []>} : vector<16x32xf32>, vector<32x32xf32>, vector<16x32xf32> -> vector<16x32xf32>
    %25 = vector.broadcast %5 : vector<1x32xf32> to vector<16x32xf32>
    %26 = arith.addf %24, %25 : vector<16x32xf32>
    %cst_15 = arith.constant 0.000000e+00 : f32
    %27 = vector.broadcast %cst_15 : f32 to vector<16x32xf32>
    %28 = arith.maximumf %26, %27 : vector<16x32xf32>
    %c16 = arith.constant 16 : index
    %c0_16 = arith.constant 0 : index
    %29 = vector.load %arg1[%c16, %c0_16] : memref<32x16xf32, #tpu.memory_space<vmem>>, vector<16x16xf32>
    %30 = vector.extract_strided_slice %29 {offsets = [0, 0], sizes = [16, 1], strides = [1, 1]} : vector<16x16xf32> to vector<16x1xf32>
    %31 = vector.broadcast %30 : vector<16x1xf32> to vector<16x32xf32>
    %32 = arith.mulf %28, %31 : vector<16x32xf32>
    %c0_17 = arith.constant 0 : index
    %c0_18 = arith.constant 0 : index
    %33 = vector.load %arg3[%c0_17, %c0_18] : memref<16x32xf32, #tpu.memory_space<vmem>>, vector<16x32xf32>
    tpu.vector_store %arg3[%c0_17, %c0_18], %32 {strides = array<i32>} : memref<16x32xf32, #tpu.memory_space<vmem>>, vector<16x32xf32>,
    return
  }
}

</mosaic_0001>

<bundles_post_ra>
// kernel: simple_encoder_decoder_forward.1
= control target key start
LH: loop header
LB: loop body
LE: loop exit
PB: predicated region body
PF: predicated region fallthrough
CT: control target
= control target key end

     0   :  { %v1412_v2 = vmov 0   ;;  %s1575_s0 = inlined_call_operand.vmem [shape: s32[32,1], index: 0, kind: input, shape index: {}]   ;;  %s1576_s1 = inlined_call_operand.vmem [shape: f32[32,16], index: 1, kind: input, shape index: {}]   ;;  %s1577_s2 = inlined_call_operand.vmem [shape: f32[144,32], index: 2, kind: input, shape index: {}]   ;;  %s1578_s3 = inlined_call_operand.hbm [shape: f32[16,32], index: 3, kind: output, shape index: {}]  }
   0x1   :  { %v35_v0 = vld [vmem:[%s1575_s0 + $0x10] sm:$0xff]  ;;  %v33_v1 = vld [vmem:[%s1575_s0] sm:$0xff]  ;;  %1387 = vset.pattern.permute.xlu1 %v1412_v2  ;;  %1386 = vset.pattern.permute.xlu0 %v1412_v2  ;;  %v16_v4 = vld [vmem:[%s1577_s2 + $0x8] sm:$0xff] }
   0x2   :  { %46 = vperm.xlu1 %1387, %v35_v0   ;;  %40 = vperm.xlu0 %1386, %v33_v1   ;;  %v15_v3 = vld [vmem:[%s1577_s2] sm:$0xff]  ;;  %v17_v5 = vld [vmem:[%s1577_s2 + $0x10] sm:$0xff]  ;;  %v36_v6 = vld [vmem:[%s1575_s0 + $0x18] sm:$0xff]  ;;  %v80_v9 = vand.u32 4294901760, %v16_v4 }
   0x3   :  { %v34_v7 = vld [vmem:[%s1575_s0 + $0x8] sm:$0xff]  ;;  %v77_v8 = vand.u32 4294901760, %v15_v3  ;;  %v18_v10 = vld [vmem:[%s1577_s2 + $0x18] sm:$0xff]  ;;  %v83_v11 = vand.u32 4294901760, %v17_v5 }
   0x4   :  { %v86_v12 = vand.u32 4294901760, %v18_v10 }
   0x5   :  { %8 = vsyncpa [#allocation3], 0  ;;  %v1461_v13 = vpack.c.bf16 %v80_v9, %v77_v8  ;;  %v187_v14 = vsub.f32 %v15_v3, %v77_v8  ;;  %v194_v15 = vsub.f32 %v16_v4, %v80_v9  ;;  %v201_v16 = vsub.f32 %v17_v5, %v83_v11  ;;  %v1032_v18 = vld [vmem:[%s1576_s1 + $0x18] sm:$0xff]  ;;  %v1031_v19 = vld [vmem:[%s1576_s1 + $0x10] sm:$0xff]  ;;  %s1414_s7 = smov [#allocation2]  }
   0x6   :  { %49 = vperm.xlu1 %1387, %v36_v6   ;;  %43 = vperm.xlu0 %1386, %v34_v7   ;;  %v208_v17 = vsub.f32 %v18_v10, %v86_v12  ;;  %v1469_v21 = vpack.c.bf16 %v86_v12, %v83_v11  ;;  %v37_v39 = vlaneseq  ;;  %vm63_vm0 = vcmask 261120   ;;  %v19_v6 = vld [vmem:[%s1577_s2 + $0x20] sm:$0xff]  ;;  %v20_v7 = vld [vmem:[%s1577_s2 + $0x28] sm:$0xff]  ;;  %v21_v9 = vld [vmem:[%s1577_s2 + $0x30] sm:$0xff]  ;;  %s1052_s8 = sshll.u32 %s1414_s7, 4  ;;  %s1053_s8 = int_to_ptr.vmem [resolvable:$true] %s1052_s8 }
   0x7   :  { %v1299_v20 = vpack.c.bf16 %v194_v15, %v187_v14  ;;  %1284 = vmatprep.subr.bf16.mxu1 %v1461_v13  ;;  %v188_v23 = vand.u32 4294901760, %v187_v14  ;;  %v195_v24 = vand.u32 4294901760, %v194_v15  ;;  %v202_v29 = vand.u32 4294901760, %v201_v16  ;;  %v22_v10 = vld [vmem:[%s1577_s2 + $0x38] sm:$0xff]  ;;  %s1388_s9 = scalar_lea.vmem %s1053_s8, 256  ;;  %p1393_p1 = scmp.lt.s32.totalorder %s1053_s8, %s1053_s8 }
   0x8   :  { %v1303_v22 = vpack.c.bf16 %v208_v17, %v201_v16  ;;  %1286 = vmatpush3.bf16.msra.mxu1 %v1461_v13  ;;  %v209_v30 = vand.u32 4294901760, %v208_v17  ;;  %v38_v40 = vand.u32 127, %v37_v39  ;;  %v1413_v43 = vmov 0.0   ;;  %p1389_p0 = scmp.ne.s32.totalorder %s1053_s8, %s1388_s9  ;;  %p1394_p2 = scmp.lt.s32.totalorder %s1388_s9, %s1388_s9 }
   0x9   :  { %1300 = vmatprep.subr.bf16.mxu0 %v1299_v20  ;;  %1288 = vmatprep.subr.bf16.mxu1 %v1469_v21  ;;  %v189_v25 = vsub.f32 %v187_v14, %v188_v23  ;;  %v196_v26 = vsub.f32 %v194_v15, %v195_v24  ;;  %v203_v32 = vsub.f32 %v201_v16, %v202_v29  ;;  %vm779_vm5 = vcmask 130048  }
   0xa   :  { %1040 = vperm.xlu1 %1387, %v1032_v18   ;;  %1035 = vperm.xlu0 %1386, %v1031_v19   ;;  %v210_v33 = vsub.f32 %v208_v17, %v209_v30  ;;  %v1315_v34 = vpack.c.bf16 %v195_v24, %v188_v23  ;;  %v1319_v38 = vpack.c.bf16 %v209_v30, %v202_v29  ;;  %v25_v23 = vld [vmem:[%s1577_s2 + $0x50] sm:$0xff]  ;;  %p1395_p3 = por %p1394_p2, %p1393_p1 }
   0xb   :  { %1302 = vmatpush3.bf16.msra.mxu0 %v1299_v20  ;;  %v190_v27 = vand.u32 4294901760, %v189_v25  ;;  %v197_v28 = vand.u32 4294901760, %v196_v26  ;;  %v204_v35 = vand.u32 4294901760, %v203_v32  ;;  %v1331_v8 = vpack.c.bf16 %v20_v7, %v19_v6  ;;  %v777_v20 = vld [vmem:[%s1576_s1] sm:$0xff]  ;;  %v26_v25 = vld [vmem:[%s1577_s2 + $0x58] sm:$0xff] }
   0xc   :  { %1304 = vmatprep.subr.bf16.mxu0 %v1303_v22  ;;  %1290 = vmatpush3.bf16.msra.mxu1 %v1469_v21  ;;  %v211_v36 = vand.u32 4294901760, %v210_v33  ;;  %v1335_v11 = vpack.c.bf16 %v22_v10, %v21_v9  ;;  %v1347_v26 = vpack.c.bf16 %v26_v25, %v25_v23  ;;  %p1396_p4 = pnand %p1395_p3, %p1389_p0 }
   0xd   :  { %v1291_v31 = vpack.c.bf16 %v197_v28, %v190_v27  ;;  %v1079_v27 = vld [vmem:[%s1577_s2 + $0x80] ss:$0 sm:$0xff] }
   0xe   :  { %v1295_v37 = vpack.c.bf16 %v211_v36, %v204_v35  ;;  %v778_v35 = vld [vmem:[%s1576_s1 + $0x8] sm:$0xff]  ;;  %v27_v36 = vld [vmem:[%s1577_s2 + $0x60] sm:$0xff] }
   0xf   :  { %1306 = vmatpush3.bf16.msra.mxu0 %v1303_v22  ;;  %1292 = vmatprep.subr.bf16.mxu1 %v1291_v31  ;;  %v24_v22 = vld [vmem:[%s1577_s2 + $0x48] sm:$0xff] }
  0x10   :  { %1308 = vmatprep.subr.bf16.mxu0 %v1461_v13 }
  0x81   :  { %v47_v41 = vpop.permute.xlu1 %46  ;;  %v41_v42 = vpop.permute.xlu0 %40 }
  0x82   :  { %vm53_vm1 = vcmp.eq.s32.totalorder %v47_v41, %v38_v40  ;;  %vm51_vm2 = vcmp.eq.s32.totalorder %v41_v42, %v38_v40  ;;  %v29_v41 = vld [vmem:[%s1577_s2 + $0x70] sm:$0xff]  ;;  %v30_v42 = vld [vmem:[%s1577_s2 + $0x78] sm:$0xff] }
  0x83   :  { %v1476_v44 = vsel %vm53_vm1, 1.0, %v1413_v43  ;;  %v1063_v45 = vsel %vm51_vm2, 1.0, %v1413_v43 }
  0x84   :  { %v65_v46 = vsel %vm63_vm0, %v1063_v45, 0  ;;  %v71_v47 = vsel %vm63_vm0, %v1476_v44, 0 }
  0x85   :  { %v50_v48 = vpop.permute.xlu1 %49  ;;  %v44_v49 = vpop.permute.xlu0 %43  ;;  %v146_v50 = vsub.f32 %v65_v46, %v65_v46  ;;  %v166_v51 = vsub.f32 %v71_v47, %v71_v47 }
  0x86   :  { %vm54_vm3 = vcmp.eq.s32.totalorder %v50_v48, %v38_v40  ;;  %vm52_vm4 = vcmp.eq.s32.totalorder %v44_v49, %v38_v40  ;;  %v1086_v48 = vld [vmem:[%s1577_s2 + $0x88] ss:$0 sm:$0xff] }
  0x87   :  { %v1066_v52 = vsel %vm54_vm3, 1.0, %v1413_v43  ;;  %v1064_v53 = vsel %vm52_vm4, 1.0, %v1413_v43  ;;  %1195 = vmatprep.mubr.f32.mxu0 %v146_v50  ;;  %v147_v54 = vand.u32 4294901760, %v146_v50  ;;  %v167_v57 = vand.u32 4294901760, %v166_v51 }
  0x88   :  { %v68_v55 = vsel %vm63_vm0, %v1064_v53, 0  ;;  %v74_v56 = vsel %vm63_vm0, %v1066_v52, 0  ;;  %v1355_v43 = vpack.c.bf16 %v30_v42, %v29_v41 }
  0x89   :  { %v156_v58 = vsub.f32 %v68_v55, %v68_v55  ;;  %v148_v59 = vsub.f32 %v146_v50, %v147_v54  ;;  %v176_v60 = vsub.f32 %v74_v56, %v74_v56  ;;  %v168_v0 = vsub.f32 %v166_v51, %v167_v57  ;;  %v1036_v56 = vpop.permute.xlu0 %1035 }
  0x8b   :  { %1196 = vmatmul.mubr.f32.vlgmr.msra.gmra.mrb[0].mxu0 %v156_v58  ;;  %v149_v61 = vand.u32 4294901760, %v148_v59  ;;  %v157_v62 = vand.u32 4294901760, %v156_v58  ;;  %v177_v63 = vand.u32 4294901760, %v176_v60  ;;  %v169_v4 = vand.u32 4294901760, %v168_v0 }
  0x8c   :  { %1198 = vmatprep.mubr.f32.mxu0 %v166_v51  ;;  %1310 = vmatpush3.bf16.msra.mxu0 %v1461_v13 }
  0x8d   :  { %1167 = vmatprep.mubr.f32.mxu1 %v149_v61  ;;  %1312 = vmatprep.subr.bf16.mxu0 %v1469_v21  ;;  %v158_v1 = vsub.f32 %v156_v58, %v157_v62  ;;  %v178_v3 = vsub.f32 %v176_v60, %v177_v63 }
  0x8f   :  { %1199 = vmatmul.mubr.f32.gmra.mrb[2].mxu0 %v176_v60  ;;  %v159_v2 = vand.u32 4294901760, %v158_v1  ;;  %v179_v5 = vand.u32 4294901760, %v178_v3 }
  0x90   :  { %1314 = vmatpush3.bf16.msra.mxu0 %v1469_v21  ;;  %1209 = vmatprep.mubr.f32.mxu0 %v147_v54  ;;  %v1041_v54 = vpop.permute.xlu1 %1040 }
  0x91   :  { %1168 = vmatmul.mubr.f32.vlgmr.msra.gmra.mrb[0].mxu1 %v159_v2  ;;  %1316 = vmatprep.subr.bf16.mxu0 %v1315_v34 }
  0x92   :  { %1170 = vmatprep.mubr.f32.mxu1 %v169_v4  ;;  %1294 = vmatpush3.bf16.msra.mxu1 %v1291_v31 }
  0x93   :  { %1210 = vmatmul.mubr.f32.vlgmr.msra.gmra.mrb[0].mxu0 %v157_v62  ;;  %1296 = vmatprep.subr.bf16.mxu1 %v1295_v37 }
  0x94   :  { %1212 = vmatprep.mubr.f32.mxu0 %v167_v57  ;;  %1318 = vmatpush3.bf16.msra.mxu0 %v1315_v34 }
  0x95   :  { %1171 = vmatmul.mubr.f32.gmra.mrb[2].mxu1 %v179_v5  ;;  %1320 = vmatprep.subr.bf16.mxu0 %v1319_v38 }
  0x96   :  { %1298 = vmatpush3.bf16.msra.mxu1 %v1295_v37  ;;  %1181 = vmatprep.mubr.msk.f32.mxu1 %vm63_vm0, %v1063_v45  ;;  %v28_v37 = vld [vmem:[%s1577_s2 + $0x68] sm:$0xff] }
  0x97   :  { %1213 = vmatmul.mubr.f32.gmra.mrb[2].mxu0 %v177_v63  ;;  %1332 = vmatprep.subr.bf16.mxu1 %v1331_v8 }
  0x98   :  { %1322 = vmatpush3.bf16.msra.mxu0 %v1319_v38  ;;  %1223 = vmatprep.mubr.msk.f32.mxu0 %vm63_vm0, %v1063_v45  ;;  %v1351_v38 = vpack.c.bf16 %v28_v37, %v27_v36 }
  0x99   :  { %1182 = vmatmul.mubr.msk.f32.vlgmr.msra.gmra.mrb[0].mxu1 %vm63_vm0, %v1064_v53  ;;  %1324 = vmatprep.subr.bf16.mxu0 %v1461_v13 }
  0x9a   :  { %1184 = vmatprep.mubr.msk.f32.mxu1 %vm63_vm0, %v1476_v44  ;;  %1334 = vmatpush3.bf16.msra.mxu1 %v1331_v8 }
  0x9b   :  { %1224 = vmatmul.mubr.msk.f32.vlgmr.msra.gmra.mrb[0].mxu0 %vm63_vm0, %v1064_v53  ;;  %1336 = vmatprep.subr.bf16.mxu1 %v1335_v11 }
  0x9c   :  { %1226 = vmatprep.mubr.msk.f32.mxu0 %vm63_vm0, %v1476_v44  ;;  %1326 = vmatpush3.bf16.msra.mxu0 %v1461_v13 }
  0x9d   :  { %1185 = vmatmul.mubr.msk.f32.gmra.mrb[2].mxu1 %vm63_vm0, %v1066_v52  ;;  %1328 = vmatprep.subr.bf16.mxu0 %v1469_v21 }
  0x9e   :  { %1338 = vmatpush3.bf16.msra.mxu1 %v1335_v11 }
  0x9f   :  { %1227 = vmatmul.mubr.msk.f32.gmra.mrb[2].mxu0 %vm63_vm0, %v1066_v52 }
  0xa0   :  { %1330 = vmatpush3.bf16.msra.mxu0 %v1469_v21  ;;  %1237 = vmatprep.mubr.msk.f32.mxu0 %vm63_vm0, %v1063_v45  ;;  %v23_v21 = vld [vmem:[%s1577_s2 + $0x40] sm:$0xff] }
  0xa1   :  { %v1343_v24 = vpack.c.bf16 %v24_v22, %v23_v21 }
  0xa3   :  { %1238 = vmatmul.mubr.msk.f32.vlgmr.msra.gmra.mrb[0].mxu0 %vm63_vm0, %v1064_v53  ;;  %1344 = vmatprep.subr.bf16.mxu0 %v1343_v24 }
  0xa4   :  { %1240 = vmatprep.mubr.msk.f32.mxu0 %vm63_vm0, %v1476_v44  ;;  %1346 = vmatpush3.bf16.msra.mxu0 %v1343_v24 }
  0xa5   :  { %1348 = vmatprep.subr.bf16.mxu0 %v1347_v26 }
  0xa7   :  { %1241 = vmatmul.mubr.msk.f32.gmra.mrb[2].mxu0 %vm63_vm0, %v1066_v52 }
  0xa8   :  { %1350 = vmatpush3.bf16.msra.mxu0 %v1347_v26 }
 0x16c   :  { %v1183_v12 = vpop.f32.mrb[0].mxu1 }
 0x16d   :  { %v272_v13 = vpop.f32.mrb[1].mxu1 }
 0x170   :  { %v1186_v14 = vpop.f32.mrb[2].mxu1 }
 0x171   :  { %v284_v15 = vpop.f32.mrb[3].mxu1 }
 0x176   :  { %v1239_v16 = vpop.f32.mrb[0].mxu0 }
 0x177   :  { %v1359_v17 = vadd.f32 %v1239_v16, %v1183_v12  ;;  %v668_v18 = vpop.f32.mrb[1].mxu0 }
 0x178   :  { %v1360_v19 = vadd.f32 %v668_v18, %v272_v13 }
 0x17a   :  { %1251 = vmatprep.mubr.msk.f32.mxu1 %vm63_vm0, %v1360_v19 }
 0x17b   :  { %1252 = vmatmul.mubr.msk.f32.vlgmr.msra.gmra.mrb[4].mxu1 %vm63_vm0, %v1359_v17 }
 0x17c   :  { %1258 = vmatprep.mubr.msk.f32.mxu1 %vm779_vm5, %v777_v20 }
 0x24e   :  { %v1253_v28 = vpop.f32.mrb[4].mxu1 }
 0x24f   :  { %v772_v29 = vadd.f32 %v1253_v28, %v1079_v27  ;;  %v766_v30 = vpop.f32.mrb[5].mxu1 }
 0x250   :  { %v767_v31 = vadd.f32 %v1079_v27, %v766_v30 }
 0x251   :  { %v776_v32 = vmax.f32 %v772_v29, 0.0 }
 0x252   :  { %v775_v33 = vmax.f32 %v767_v31, 0.0 }
 0x254   :  { %v1339_v34 = vpack.c.bf16 %v776_v32, %v775_v33 }
 0x256   :  { %1340 = vmatprep.subr.bf16.mxu1 %v1339_v34 }
 0x257   :  { %1342 = vmatpush3.bf16.msra.mxu1 %v1339_v34 }
 0x258   :  { %1352 = vmatprep.subr.bf16.mxu1 %v1351_v38 }
 0x25a   :  { %1259 = vmatmul.mubr.msk.f32.vlgmr.msra.gmra.mrb[6].mxu1 %vm779_vm5, %v778_v35 }
 0x25b   :  { %1354 = vmatpush3.bf16.msra.mxu1 %v1351_v38 }
 0x25c   :  { %1356 = vmatprep.subr.bf16.mxu1 %v1355_v43 }
 0x25f   :  { %1358 = vmatpush3.bf16.msra.mxu1 %v1355_v43 }
 0x32d   :  { %v1260_v39 = vpop.f32.mrb[6].mxu1 }
 0x32e   :  { %v852_v40 = vpop.f32.mrb[7].mxu1 }
 0x32f   :  { %1269 = vmatprep.mubr.msk.f32.mxu0 %vm63_vm0, %v852_v40 }
 0x330   :  { %1270 = vmatmul.mubr.msk.f32.vlgmr.msra.gmra.mrb[2].mxu0 %vm63_vm0, %v1260_v39 }
 0x403   :  { %v1271_v44 = vpop.f32.mrb[2].mxu0 }
 0x404   :  { %v1361_v45 = vadd.f32 %v1271_v44, %v1186_v14  ;;  %v933_v46 = vpop.f32.mrb[3].mxu0 }
 0x405   :  { %v1362_v47 = vadd.f32 %v933_v46, %v284_v15 }
 0x407   :  { %1280 = vmatprep.mubr.msk.f32.mxu1 %vm63_vm0, %v1362_v47 }
 0x408   :  { %1281 = vmatmul.mubr.msk.f32.vlgmr.msra.gmra.mrb[8].mxu1 %vm63_vm0, %v1361_v45 }
 0x4db   :  { %v1282_v49 = vpop.f32.mrb[8].mxu1 }
 0x4dc   :  { %v1026_v50 = vadd.f32 %v1282_v49, %v1086_v48  ;;  %v1020_v51 = vpop.f32.mrb[9].mxu1 }
 0x4dd   :  { %v1021_v52 = vadd.f32 %v1086_v48, %v1020_v51 }
 0x4de   :  { %v1030_v53 = vmax.f32 %v1026_v50, 0.0 }
 0x4df   :  { %v1029_v55 = vmax.f32 %v1021_v52, 0.0 }
 0x4e0   :  { %v1044_v57 = vmul.f32 %v1041_v54, %v1030_v53 }
 0x4e1   :  { %v1043_v58 = vmul.f32 %v1036_v56, %v1029_v55 }
 0x4e2   :  { %1046 = vst.msk [vmem:[#allocation2 + $0x8] sm:$0xff] %vm63_vm0, %v1044_v57 }
 0x4e3   :  { %1045 = vst.msk [vmem:[#allocation2] sm:$0xff] %vm63_vm0, %v1043_v58 }
 0x4e4   :  { %1399 = shalt.err (!%p1396_p4)
}
 0x4e5   :  { %s1400_s11 = scalar_lea.hbm %s1578_s3, 256 }
 0x4e6   :  { %p1401_p5 = scmp.ne.s32.totalorder %s1578_s3, %s1400_s11  ;;  %p1404_p6 = scmp.lt.u32.totalorder %s1400_s11, %s1578_s3 }
 0x4e8   :  { %p1406_p7 = pnand %p1404_p6, %p1401_p5 }
 0x4ea   :  { %1409 = shalt.err (!%p1406_p7)
}
 0x4eb   :  { %s1415_s16 = smov 128   ;;  %s1416_s17 = smov 8  }
 0x4ec   :  { %1058 = dma.vmem_to_hbm [thread:$0]  %s1053_s8, 256, %s1578_s3, [#allocation3], %s1415_s16, %s1415_s16, %s1416_s17  }
 0x4ed   :  { %1410 = dma.done.wait [#allocation3], 256  }
 0x4ee   :  { %1411 = vsyncadd [#allocation3], 4294967040 }
 0x4ef   :  { %1062 = vsyncpa [#allocation3], 1 }

</bundles_post_ra>
